<compile_context>
chip_gen: v5e
topology: v5e:2x2
jax: 0.10.0
libtpu: 0.0.40
codegen_flags: <defaults>
</compile_context>

<pallas_src>
import functools

import jax
import jax.numpy as jnp
import numpy as np
from jax.experimental import pallas as pl
from jax.experimental.pallas import tpu as pltpu


def _round_up(v, m):
    return (v + m - 1) // m * m


def _layout(n_in, n_hidden, n_out):
    """Row/column layout shared by init_params and the kernel wrapper."""
    H = n_hidden
    Cb = _round_up(max(H, n_in, n_out), 128)   # per-gate 128-aligned col block
    Lw = 3 * Cb                                # [z | r | x2h-candidate]
    row_zrc_x = 0                              # bf16 slab rows: x-part of fused W
    row_zrc_h = _round_up(n_in, 16)            # h-part of fused W
    row_h2h = row_zrc_h + _round_up(H, 16)     # W_h2h
    row_h2o = row_h2h + _round_up(H, 16)       # W_h2o
    rows_w = row_h2o + _round_up(H, 16)
    row_h2f = 8                                # f32 slab: rows 0..2 biases, 8.. W_h2f
    rows_f = row_h2f + _round_up(H, 8)
    return dict(Cb=Cb, Lw=Lw, row_zrc_x=row_zrc_x, row_zrc_h=row_zrc_h,
                row_h2h=row_h2h, row_h2o=row_h2o, rows_w=rows_w,
                row_h2f=row_h2f, rows_f=rows_f)


def _surprise_gru_kernel(
    u_ref,       # (T, 1)       SMEM f32: per-step uniforms for the Bernoulli gate
    x_ref,       # (1, B, n_in) VMEM f32: this step's input
    h0_ref,      # (B, H)       VMEM f32: initial hidden (resident)
    w_ref,       # (Rw, Lw)     VMEM bf16: packed z|r|x2h / h2h / h2o weights (resident)
    f_ref,       # (Rf, Lw)     VMEM f32: biases + h2f weights (f32 for the gate)
    out_ref,     # (1, B, Lo)   VMEM f32: packed [log_softmax | 0]
    hfin_ref,    # (B, H)       VMEM f32: final hidden (resident accumulator)
    h_scr,       # (B, H)       VMEM f32 scratch: hidden carried across steps
    *,
    n_in, n_hidden, n_out,
    col_r, col_c,
    row_zrc_x, row_zrc_h, row_h2h, row_h2o, row_h2f,
):
    t = pl.program_id(0)
    H = n_hidden
    B = x_ref.shape[1]
    Lo = out_ref.shape[2]

    @pl.when(t == 0)
    def _():
        h_scr[...] = h0_ref[...]

    x = x_ref[0]                                   # (B, n_in) f32
    h = h_scr[...]                                 # (B, H)    f32

    # ---- surprise gate (all f32): f = h2f(h); aux = mean|f - x|;
    #      surprise ~ Bernoulli(clip(1 - aux, 0, 1)) via inverse-CDF on u[t].
    f_full = (jnp.dot(h, f_ref[row_h2f:row_h2f + H, :],
                      preferred_element_type=jnp.float32) + f_ref[2:3, :])
    f = f_full[:, 0:n_in]
    aux = jnp.sum(jnp.abs(f - x), axis=1, keepdims=True)                  # (B,1)
    aux = jnp.sum(aux, axis=0, keepdims=True) * (1.0 / float(B * n_in))   # (1,1)
    p_keep = jnp.clip(1.0 - aux, 0.0, 1.0)      # torch.bernoulli needs p in [0,1]
    gate = (u_ref[t, 0] < p_keep).astype(jnp.float32)                     # (1,1)

    # ---- fused z / r / x2h-candidate matmul: bf16 weights, f32 accumulation,
    #      W_big split into x-rows + h-rows (no in-kernel [x|h] concat).
    g = (jnp.dot(x.astype(jnp.bfloat16), w_ref[row_zrc_x:row_zrc_x + n_in, :],
                 preferred_element_type=jnp.float32)
         + jnp.dot(h.astype(jnp.bfloat16), w_ref[row_zrc_h:row_zrc_h + H, :],
                   preferred_element_type=jnp.float32)
         + f_ref[0:1, :])                                                 # (B,Lw)
    z = jax.nn.sigmoid(g[:, 0:H])                  # 128-aligned column blocks:
    r = jax.nn.sigmoid(g[:, col_r:col_r + H])      # no lane rotates needed
    cand_x = g[:, col_c:col_c + H]

    cand_h = jnp.dot((r * h).astype(jnp.bfloat16), w_ref[row_h2h:row_h2h + H, :],
                     preferred_element_type=jnp.float32)
    cand = jnp.tanh(cand_x + cand_h[:, 0:H])
    h_upd = z * h + (1.0 - z) * cand
    h_new = gate * h_upd + (1.0 - gate) * h        # surprise == 0 -> keep old h

    h_scr[...] = h_new
    hfin_ref[...] = h_new                          # resident; written back once

    # ---- output head: log_softmax(h2o(dropout(h_new))) over dim=1.
    # TODO(synk): nn.Dropout() training-mode masking not modelled (eval/identity).
    logits_full = (jnp.dot(h_new.astype(jnp.bfloat16),
                           w_ref[row_h2o:row_h2o + H, :],
                           preferred_element_type=jnp.float32) + f_ref[1:2, :])
    logits = logits_full[:, 0:n_out]
    m = jnp.max(logits, axis=1, keepdims=True)
    lse = jnp.log(jnp.sum(jnp.exp(logits - m), axis=1, keepdims=True)) + m
    logp = logits - lse

    # Lane-dense full-width store; wrapper slices [:, :, :n_out] once over T.
    if Lo > n_out:
        packed = jnp.concatenate(
            [logp, jnp.zeros((B, Lo - n_out), jnp.float32)], axis=1)
    else:
        packed = logp
    out_ref[0] = packed


@functools.partial(jax.jit, static_argnames=("n_in", "n_hidden", "n_out"))
def surprise_gru_forward(x_seq, h0, w_slab, f_slab, u, *, n_in, n_hidden, n_out):
    """Steps the SurpriseGRU cell over T time steps in one pallas_call.

    x_seq: (T, B, n_in) f32, h0: (B, H) f32, u: (T, 1) f32 uniforms.
    Returns (log_probs (T, B, n_out), final hidden (B, H))."""
    T, B, _ = x_seq.shape
    H = n_hidden
    L = _layout(n_in, H, n_out)
    Lo = _round_up(n_out, 128)

    kernel = functools.partial(
        _surprise_gru_kernel,
        n_in=n_in, n_hidden=H, n_out=n_out,
        col_r=L["Cb"], col_c=2 * L["Cb"],
        row_zrc_x=L["row_zrc_x"], row_zrc_h=L["row_zrc_h"],
        row_h2h=L["row_h2h"], row_h2o=L["row_h2o"], row_h2f=L["row_h2f"])

    grid_spec = pltpu.PrefetchScalarGridSpec(
        num_scalar_prefetch=0,
        grid=(T,),
        in_specs=[
            pl.BlockSpec(memory_space=pltpu.MemorySpace.SMEM),          # u (T,1)
            pl.BlockSpec((1, B, n_in), lambda t: (t, 0, 0)),            # x step
            pl.BlockSpec((B, H), lambda t: (0, 0)),                     # h0 resident
            pl.BlockSpec((L["rows_w"], L["Lw"]), lambda t: (0, 0)),     # bf16 weights resident
            pl.BlockSpec((L["rows_f"], L["Lw"]), lambda t: (0, 0)),     # f32 biases + h2f resident
        ],
        out_specs=[
            pl.BlockSpec((1, B, Lo), lambda t: (t, 0, 0)),              # per-step logp
            pl.BlockSpec((B, H), lambda t: (0, 0)),                     # final hidden
        ],
        scratch_shapes=[pltpu.VMEM((B, H), jnp.float32)],               # carried hidden
    )

    logp_packed, h_final = pl.pallas_call(
        kernel,
        out_shape=(jax.ShapeDtypeStruct((T, B, Lo), jnp.float32),
                   jax.ShapeDtypeStruct((B, H), jnp.float32)),
        grid_spec=grid_spec,
        compiler_params=pltpu.CompilerParams(
            dimension_semantics=("arbitrary",),        # sequential recurrence
            vmem_limit_bytes=32 * 1024 * 1024),
    )(u, x_seq, h0, w_slab, f_slab)

    return logp_packed[:, :, :n_out], h_final


def init_params(key, n_in, n_hidden, n_out):
    """PyTorch-Linear-style init (U(-1/sqrt(fan_in), 1/sqrt(fan_in))) packed
    into (bf16 weight slab, f32 bias + h2f slab) consumed by the kernel."""
    H = n_hidden
    keys = jax.random.split(key, 10)
    ki = iter(keys)

    def lin(fan_in, fan_out, bias=True):
        bound = 1.0 / np.sqrt(fan_in)
        w = np.asarray(jax.random.uniform(next(ki), (fan_out, fan_in),
                                          jnp.float32, -bound, bound))
        b = (np.asarray(jax.random.uniform(next(ki), (fan_out,),
                                           jnp.float32, -bound, bound))
             if bias else None)
        return w, b

    w_i2g, b_i2g = lin(n_in + H, 2 * H)      # rows 0:H -> z, rows H:2H -> r
    w_x2h, b_x2h = lin(n_in, H)
    w_h2h, _ = lin(H, H, bias=False)
    w_h2o, b_h2o = lin(H, n_out)
    w_h2f, b_h2f = lin(H, n_in)

    L = _layout(n_in, H, n_out)
    Cb = L["Cb"]

    # bf16 weight slab: fused [z | r | x2h] (x-rows then h-rows), W_h2h, W_h2o.
    w_slab = np.zeros((L["rows_w"], L["Lw"]), np.float32)
    xr = L["row_zrc_x"]
    w_slab[xr:xr + n_in, 0:H] = w_i2g[:H, :n_in].T               # z, x-part
    w_slab[xr:xr + n_in, Cb:Cb + H] = w_i2g[H:, :n_in].T         # r, x-part
    w_slab[xr:xr + n_in, 2 * Cb:2 * Cb + H] = w_x2h.T            # cand, x only
    hr = L["row_zrc_h"]
    w_slab[hr:hr + H, 0:H] = w_i2g[:H, n_in:].T                  # z, h-part
    w_slab[hr:hr + H, Cb:Cb + H] = w_i2g[H:, n_in:].T            # r, h-part
    w_slab[L["row_h2h"]:L["row_h2h"] + H, 0:H] = w_h2h.T
    w_slab[L["row_h2o"]:L["row_h2o"] + H, 0:n_out] = w_h2o.T

    # f32 slab: row0 fused [b_z|b_r|b_x2h], row1 b_h2o, row2 b_h2f, rows 8.. W_h2f.
    f_slab = np.zeros((L["rows_f"], L["Lw"]), np.float32)
    f_slab[0, 0:H] = b_i2g[:H]
    f_slab[0, Cb:Cb + H] = b_i2g[H:]
    f_slab[0, 2 * Cb:2 * Cb + H] = b_x2h
    f_slab[1, 0:n_out] = b_h2o
    f_slab[2, 0:n_in] = b_h2f
    f_slab[L["row_h2f"]:L["row_h2f"] + H, 0:n_in] = w_h2f.T

    return jnp.asarray(w_slab, jnp.bfloat16), jnp.asarray(f_slab, jnp.float32)


if __name__ == "__main__":
    T, B, N_IN, N_HIDDEN, N_OUT = 8, 8, 16, 32, 8

    key = jax.random.PRNGKey(0)
    k_x, k_h, k_p, k_u = jax.random.split(key, 4)

    # "inputs must be in range [0,1] for surprise gate"
    x_seq = jax.random.uniform(k_x, (T, B, N_IN), jnp.float32, 0.0, 1.0)
    h0 = jax.random.uniform(k_h, (B, N_HIDDEN), jnp.float32, 0.0, 1.0)
    w_slab, f_slab = init_params(k_p, N_IN, N_HIDDEN, N_OUT)
    # One independent uniform per step for the Bernoulli surprise gate
    # (inverse-CDF sampling matches torch.bernoulli distributionally).
    u = jax.random.uniform(k_u, (T, 1), jnp.float32)

    output, h_final = surprise_gru_forward(
        x_seq, h0, w_slab, f_slab, u,
        n_in=N_IN, n_hidden=N_HIDDEN, n_out=N_OUT)
    jax.block_until_ready((output, h_final))

    assert output.shape == (T, B, N_OUT)
    assert h_final.shape == (B, N_HIDDEN)
    assert bool(jnp.all(jnp.isfinite(output)))
    assert bool(jnp.all(jnp.isfinite(h_final)))
    # log-softmax rows must (exp-)sum to ~1 at every step
    assert bool(jnp.allclose(jnp.sum(jnp.exp(output), axis=-1), 1.0, atol=1e-4))

    print("KERNEL_OK")
</pallas_src>

<mosaic_0001>
module attributes {stable_mosaic.version = 11 : i64} {
  func.func @_surprise_gru_kernel(%arg0: i32, %arg1: memref<8x1xf32, #tpu.memory_space<smem>>, %arg2: memref<1x8x16xf32, #tpu.memory_space<vmem>>, %arg3: memref<8x32xf32, #tpu.memory_space<vmem>>, %arg4: memref<112x384xbf16, #tpu.memory_space<vmem>>, %arg5: memref<40x384xf32, #tpu.memory_space<vmem>>, %arg6: memref<1x8x128xf32, #tpu.memory_space<vmem>>, %arg7: memref<8x32xf32, #tpu.memory_space<vmem>>, %arg8: memref<8x32xf32, #tpu.memory_space<vmem>>) attributes {dimension_semantics = [#tpu.dimension_semantics<arbitrary>], iteration_bounds = array<i64: 8>, scalar_prefetch = 0 : i64, scratch_operands = 1 : i64, tpu.core_type = #tpu.core_type<tc>, window_params = [{transform_indices = @transform_0, window_bounds = array<i64: 8, 1>}, {transform_indices = @transform_1, window_bounds = array<i64: 1, 8, 16>}, {pipeline_mode = #tpu.pipeline_mode<synchronous>, transform_indices = @transform_2, window_bounds = array<i64: 8, 32>}, {pipeline_mode = #tpu.pipeline_mode<synchronous>, transform_indices = @transform_3, window_bounds = array<i64: 112, 384>}, {pipeline_mode = #tpu.pipeline_mode<synchronous>, transform_indices = @transform_4, window_bounds = array<i64: 40, 384>}, {transform_indices = @transform_5, window_bounds = array<i64: 1, 8, 128>}, {pipeline_mode = #tpu.pipeline_mode<synchronous>, transform_indices = @transform_6, window_bounds = array<i64: 8, 32>}]} {
    %c0_i32 = arith.constant 0 : i32
    %0 = arith.cmpi eq, %arg0, %c0_i32 : i32
    %1 = arith.extui %0 : i1 to i32
    %c0_i32_0 = arith.constant 0 : i32
    %2 = arith.cmpi ne, %1, %c0_i32_0 : i32
    scf.if %2 {
      %c0_40 = arith.constant 0 : index
      %c0_41 = arith.constant 0 : index
      %99 = vector.load %arg3[%c0_40, %c0_41] : memref<8x32xf32, #tpu.memory_space<vmem>>, vector<8x32xf32>
      %c0_42 = arith.constant 0 : index
      %c0_43 = arith.constant 0 : index
      %100 = vector.load %arg8[%c0_42, %c0_43] : memref<8x32xf32, #tpu.memory_space<vmem>>, vector<8x32xf32>
      tpu.vector_store %arg8[%c0_42, %c0_43], %99 {strides = array<i32>} : memref<8x32xf32, #tpu.memory_space<vmem>>, vector<8x32xf32>,
    } else {
    }
    %c0 = arith.constant 0 : index
    %c0_1 = arith.constant 0 : index
    %c0_2 = arith.constant 0 : index
    %3 = vector.load %arg2[%c0, %c0_1, %c0_2] : memref<1x8x16xf32, #tpu.memory_space<vmem>>, vector<1x8x16xf32>
    %4 = vector.shape_cast %3 : vector<1x8x16xf32> to vector<8x16xf32>
    %c0_3 = arith.constant 0 : index
    %c0_4 = arith.constant 0 : index
    %5 = vector.load %arg8[%c0_3, %c0_4] : memref<8x32xf32, #tpu.memory_space<vmem>>, vector<8x32xf32>
    %c8 = arith.constant 8 : index
    %c0_5 = arith.constant 0 : index
    %6 = vector.load %arg5[%c8, %c0_5] : memref<40x384xf32, #tpu.memory_space<vmem>>, vector<32x384xf32>
    %cst = arith.constant dense<0.000000e+00> : vector<8x384xf32>
    %7 = tpu.matmul %5, %6, %cst {dimension_numbers = #tpu.dot_dimension_numbers<[1], [0], [0], [1], [0, 0, 1, 1], [], []>} : vector<8x32xf32>, vector<32x384xf32>, vector<8x384xf32> -> vector<8x384xf32>
    %c2 = arith.constant 2 : index
    %c0_6 = arith.constant 0 : index
    %8 = vector.load %arg5[%c2, %c0_6] : memref<40x384xf32, #tpu.memory_space<vmem>>, vector<1x384xf32>
    %9 = vector.broadcast %8 : vector<1x384xf32> to vector<8x384xf32>
    %10 = arith.addf %7, %9 : vector<8x384xf32>
    %11 = vector.extract_strided_slice %10 {offsets = [0, 0], sizes = [8, 16], strides = [1, 1]} : vector<8x384xf32> to vector<8x16xf32>
    %12 = arith.subf %11, %4 : vector<8x16xf32>
    %13 = math.absf %12 : vector<8x16xf32>
    %cst_7 = arith.constant dense<0.000000e+00> : vector<8xf32>
    %14 = vector.multi_reduction <add>, %13, %cst_7 [1] : vector<8x16xf32> to vector<8xf32>
    %15 = vector.shape_cast %14 : vector<8xf32> to vector<8x1xf32>
    %cst_8 = arith.constant dense<0.000000e+00> : vector<1xf32>
    %16 = vector.multi_reduction <add>, %15, %cst_8 [0] : vector<8x1xf32> to vector<1xf32>
    %17 = vector.shape_cast %16 : vector<1xf32> to vector<1x1xf32>
    %cst_9 = arith.constant 7.812500e-03 : f32
    %18 = vector.broadcast %cst_9 : f32 to vector<1x1xf32>
    %19 = arith.mulf %17, %18 : vector<1x1xf32>
    %cst_10 = arith.constant 1.000000e+00 : f32
    %20 = vector.broadcast %cst_10 : f32 to vector<1x1xf32>
    %21 = arith.subf %20, %19 : vector<1x1xf32>
    %cst_11 = arith.constant 0.000000e+00 : f32
    %cst_12 = arith.constant 1.000000e+00 : f32
    %22 = vector.broadcast %cst_11 : f32 to vector<1x1xf32>
    %23 = arith.maximumf %22, %21 : vector<1x1xf32>
    %24 = vector.broadcast %cst_12 : f32 to vector<1x1xf32>
    %25 = arith.minimumf %24, %23 : vector<1x1xf32>
    %26 = arith.index_cast %arg0 : i32 to index
    %c0_13 = arith.constant 0 : index
    %27 = memref.load %arg1[%26, %c0_13] : memref<8x1xf32, #tpu.memory_space<smem>>
    %28 = vector.broadcast %27 : f32 to vector<1x1xf32>
    %29 = arith.cmpf olt, %28, %25 : vector<1x1xf32>
    %30 = arith.extui %29 : vector<1x1xi1> to vector<1x1xi32>
    %31 = arith.sitofp %30 : vector<1x1xi32> to vector<1x1xf32>
    %32 = arith.truncf %4 : vector<8x16xf32> to vector<8x16xbf16>
    %c0_14 = arith.constant 0 : index
    %c0_15 = arith.constant 0 : index
    %33 = vector.load %arg4[%c0_14, %c0_15] : memref<112x384xbf16, #tpu.memory_space<vmem>>, vector<16x384xbf16>
    %cst_16 = arith.constant dense<0.000000e+00> : vector<8x384xf32>
    %34 = tpu.matmul %32, %33, %cst_16 {dimension_numbers = #tpu.dot_dimension_numbers<[1], [0], [0], [1], [0, 0, 1, 1], [], []>} : vector<8x16xbf16>, vector<16x384xbf16>, vector<8x384xf32> -> vector<8x384xf32>
    %35 = arith.truncf %5 : vector<8x32xf32> to vector<8x32xbf16>
    %c16 = arith.constant 16 : index
    %c0_17 = arith.constant 0 : index
    %36 = vector.load %arg4[%c16, %c0_17] : memref<112x384xbf16, #tpu.memory_space<vmem>>, vector<32x384xbf16>
    %cst_18 = arith.constant dense<0.000000e+00> : vector<8x384xf32>
    %37 = tpu.matmul %35, %36, %cst_18 {dimension_numbers = #tpu.dot_dimension_numbers<[1], [0], [0], [1], [0, 0, 1, 1], [], []>} : vector<8x32xbf16>, vector<32x384xbf16>, vector<8x384xf32> -> vector<8x384xf32>
    %38 = arith.addf %34, %37 : vector<8x384xf32>
    %c0_19 = arith.constant 0 : index
    %c0_20 = arith.constant 0 : index
    %39 = vector.load %arg5[%c0_19, %c0_20] : memref<40x384xf32, #tpu.memory_space<vmem>>, vector<1x384xf32>
    %40 = vector.broadcast %39 : vector<1x384xf32> to vector<8x384xf32>
    %41 = arith.addf %38, %40 : vector<8x384xf32>
    %42 = vector.extract_strided_slice %41 {offsets = [0, 0], sizes = [8, 32], strides = [1, 1]} : vector<8x384xf32> to vector<8x32xf32>
    %43 = arith.negf %42 : vector<8x32xf32>
    %44 = math.exp %43 : vector<8x32xf32>
    %cst_21 = arith.constant 1.000000e+00 : f32
    %45 = vector.broadcast %cst_21 : f32 to vector<8x32xf32>
    %46 = arith.addf %45, %44 : vector<8x32xf32>
    %47 = arith.divf %45, %46 : vector<8x32xf32>
    %48 = vector.extract_strided_slice %41 {offsets = [0, 128], sizes = [8, 32], strides = [1, 1]} : vector<8x384xf32> to vector<8x32xf32>
    %49 = arith.negf %48 : vector<8x32xf32>
    %50 = math.exp %49 : vector<8x32xf32>
    %cst_22 = arith.constant 1.000000e+00 : f32
    %51 = vector.broadcast %cst_22 : f32 to vector<8x32xf32>
    %52 = arith.addf %51, %50 : vector<8x32xf32>
    %53 = arith.divf %51, %52 : vector<8x32xf32>
    %54 = vector.extract_strided_slice %41 {offsets = [0, 256], sizes = [8, 32], strides = [1, 1]} : vector<8x384xf32> to vector<8x32xf32>
    %55 = arith.mulf %53, %5 : vector<8x32xf32>
    %56 = arith.truncf %55 : vector<8x32xf32> to vector<8x32xbf16>
    %c48 = arith.constant 48 : index
    %c0_23 = arith.constant 0 : index
    %57 = vector.load %arg4[%c48, %c0_23] : memref<112x384xbf16, #tpu.memory_space<vmem>>, vector<32x384xbf16>
    %cst_24 = arith.constant dense<0.000000e+00> : vector<8x384xf32>
    %58 = tpu.matmul %56, %57, %cst_24 {dimension_numbers = #tpu.dot_dimension_numbers<[1], [0], [0], [1], [0, 0, 1, 1], [], []>} : vector<8x32xbf16>, vector<32x384xbf16>, vector<8x384xf32> -> vector<8x384xf32>
    %59 = vector.extract_strided_slice %58 {offsets = [0, 0], sizes = [8, 32], strides = [1, 1]} : vector<8x384xf32> to vector<8x32xf32>
    %60 = arith.addf %54, %59 : vector<8x32xf32>
    %61 = math.tanh %60 : vector<8x32xf32>
    %62 = arith.mulf %47, %5 : vector<8x32xf32>
    %cst_25 = arith.constant 1.000000e+00 : f32
    %63 = vector.broadcast %cst_25 : f32 to vector<8x32xf32>
    %64 = arith.subf %63, %47 : vector<8x32xf32>
    %65 = arith.mulf %64, %61 : vector<8x32xf32>
    %66 = arith.addf %62, %65 : vector<8x32xf32>
    %67 = vector.broadcast %31 : vector<1x1xf32> to vector<8x32xf32>
    %68 = arith.mulf %67, %66 : vector<8x32xf32>
    %cst_26 = arith.constant 1.000000e+00 : f32
    %69 = vector.broadcast %cst_26 : f32 to vector<1x1xf32>
    %70 = arith.subf %69, %31 : vector<1x1xf32>
    %71 = vector.broadcast %70 : vector<1x1xf32> to vector<8x32xf32>
    %72 = arith.mulf %71, %5 : vector<8x32xf32>
    %73 = arith.addf %68, %72 : vector<8x32xf32>
    %c0_27 = arith.constant 0 : index
    %c0_28 = arith.constant 0 : index
    %74 = vector.load %arg8[%c0_27, %c0_28] : memref<8x32xf32, #tpu.memory_space<vmem>>, vector<8x32xf32>
    tpu.vector_store %arg8[%c0_27, %c0_28], %73 {strides = array<i32>} : memref<8x32xf32, #tpu.memory_space<vmem>>, vector<8x32xf32>,
    %c0_29 = arith.constant 0 : index
    %c0_30 = arith.constant 0 : index
    %75 = vector.load %arg7[%c0_29, %c0_30] : memref<8x32xf32, #tpu.memory_space<vmem>>, vector<8x32xf32>
    tpu.vector_store %arg7[%c0_29, %c0_30], %73 {strides = array<i32>} : memref<8x32xf32, #tpu.memory_space<vmem>>, vector<8x32xf32>,
    %76 = arith.truncf %73 : vector<8x32xf32> to vector<8x32xbf16>
    %c80 = arith.constant 80 : index
    %c0_31 = arith.constant 0 : index
    %77 = vector.load %arg4[%c80, %c0_31] : memref<112x384xbf16, #tpu.memory_space<vmem>>, vector<32x384xbf16>
    %cst_32 = arith.constant dense<0.000000e+00> : vector<8x384xf32>
    %78 = tpu.matmul %76, %77, %cst_32 {dimension_numbers = #tpu.dot_dimension_numbers<[1], [0], [0], [1], [0, 0, 1, 1], [], []>} : vector<8x32xbf16>, vector<32x384xbf16>, vector<8x384xf32> -> vector<8x384xf32>
    %c1 = arith.constant 1 : index
    %c0_33 = arith.constant 0 : index
    %79 = vector.load %arg5[%c1, %c0_33] : memref<40x384xf32, #tpu.memory_space<vmem>>, vector<1x384xf32>
    %80 = vector.broadcast %79 : vector<1x384xf32> to vector<8x384xf32>
    %81 = arith.addf %78, %80 : vector<8x384xf32>
    %82 = vector.extract_strided_slice %81 {offsets = [0, 0], sizes = [8, 8], strides = [1, 1]} : vector<8x384xf32> to vector<8x8xf32>
    %cst_34 = arith.constant dense<0xFF800000> : vector<8xf32>
    %83 = vector.multi_reduction <maximumf>, %82, %cst_34 [1] : vector<8x8xf32> to vector<8xf32>
    %84 = vector.shape_cast %83 : vector<8xf32> to vector<8x1xf32>
    %85 = vector.broadcast %84 : vector<8x1xf32> to vector<8x8xf32>
    %86 = arith.subf %82, %85 : vector<8x8xf32>
    %87 = math.exp %86 : vector<8x8xf32>
    %cst_35 = arith.constant dense<0.000000e+00> : vector<8xf32>
    %88 = vector.multi_reduction <add>, %87, %cst_35 [1] : vector<8x8xf32> to vector<8xf32>
    %89 = vector.shape_cast %88 : vector<8xf32> to vector<8x1xf32>
    %90 = math.log %89 : vector<8x1xf32>
    %91 = arith.addf %90, %84 : vector<8x1xf32>
    %92 = vector.broadcast %91 : vector<8x1xf32> to vector<8x8xf32>
    %93 = arith.subf %82, %92 : vector<8x8xf32>
    %cst_36 = arith.constant 0.000000e+00 : f32
    %94 = vector.broadcast %cst_36 : f32 to vector<8x120xf32>
    %95 = tpu.concatenate %93, %94 in 1 : vector<8x8xf32>, vector<8x120xf32> -> vector<8x128xf32>
    %c0_37 = arith.constant 0 : index
    %c0_38 = arith.constant 0 : index
    %c0_39 = arith.constant 0 : index
    %96 = vector.load %arg6[%c0_37, %c0_38, %c0_39] : memref<1x8x128xf32, #tpu.memory_space<vmem>>, vector<1x8x128xf32>
    %97 = vector.shape_cast %96 : vector<1x8x128xf32> to vector<8x128xf32>
    %98 = vector.shape_cast %95 : vector<8x128xf32> to vector<1x8x128xf32>
    tpu.vector_store %arg6[%c0_37, %c0_38, %c0_39], %98 {strides = array<i32>} : memref<1x8x128xf32, #tpu.memory_space<vmem>>, vector<1x8x128xf32>,
    return
  }
  func.func @transform_0(%arg0: i32) -> (i32, i32) {
    %c0_i32 = arith.constant 0 : i32
    %c0_i32_0 = arith.constant 0 : i32
    %c0_i32_1 = arith.constant 0 : i32
    return %c0_i32, %c0_i32_0 : i32, i32
  }
  func.func @transform_1(%arg0: i32) -> (i32, i32, i32) {
    %c0_i32 = arith.constant 0 : i32
    %c0_i32_0 = arith.constant 0 : i32
    %c0_i32_1 = arith.constant 0 : i32
    return %arg0, %c0_i32, %c0_i32_0 : i32, i32, i32
  }
  func.func @transform_2(%arg0: i32) -> (i32, i32) {
    %c0_i32 = arith.constant 0 : i32
    %c0_i32_0 = arith.constant 0 : i32
    %c0_i32_1 = arith.constant 0 : i32
    return %c0_i32, %c0_i32_0 : i32, i32
  }
  func.func @transform_3(%arg0: i32) -> (i32, i32) {
    %c0_i32 = arith.constant 0 : i32
    %c0_i32_0 = arith.constant 0 : i32
    %c0_i32_1 = arith.constant 0 : i32
    return %c0_i32, %c0_i32_0 : i32, i32
  }
  func.func @transform_4(%arg0: i32) -> (i32, i32) {
    %c0_i32 = arith.constant 0 : i32
    %c0_i32_0 = arith.constant 0 : i32
    %c0_i32_1 = arith.constant 0 : i32
    return %c0_i32, %c0_i32_0 : i32, i32
  }
  func.func @transform_5(%arg0: i32) -> (i32, i32, i32) {
    %c0_i32 = arith.constant 0 : i32
    %c0_i32_0 = arith.constant 0 : i32
    %c0_i32_1 = arith.constant 0 : i32
    return %arg0, %c0_i32, %c0_i32_0 : i32, i32, i32
  }
  func.func @transform_6(%arg0: i32) -> (i32, i32) {
    %c0_i32 = arith.constant 0 : i32
    %c0_i32_0 = arith.constant 0 : i32
    %c0_i32_1 = arith.constant 0 : i32
    return %c0_i32, %c0_i32_0 : i32, i32
  }
}

</mosaic_0001>

<bundles_post_ra>
// kernel: surprise_gru_forward.1
= control target key start
LH: loop header
LB: loop body
LE: loop exit
PB: predicated region body
PF: predicated region fallthrough
CT: control target
= control target key end

     0   :  { %12 = vsyncpa [#allocation6], 0  ;;  %s1482_s0 = inlined_call_operand.vmem [shape: f32[8,1], index: 0, kind: input, shape index: {}]   ;;  %s1483_s1 = inlined_call_operand.hbm [shape: f32[8,8,16], index: 1, kind: input, shape index: {}]   ;;  %s1484_s2 = inlined_call_operand.vmem [shape: f32[8,32], index: 2, kind: input, shape index: {}]   ;;  %s1485_s3 = inlined_call_operand.hbm [shape: bf16[112,384], index: 3, kind: input, shape index: {}]   ;;  %s1486_s4 = inlined_call_operand.hbm [shape: f32[40,384], index: 4, kind: input, shape index: {}]   ;;  %s1487_s5 = inlined_call_operand.hbm [shape: f32[8,8,128], index: 5, kind: output, shape index: {0}]   ;;  %s1488_s6 = inlined_call_operand.hbm [shape: f32[8,32], index: 6, kind: output, shape index: {1}]  }
   0x1   :  { %13 = vsyncpa [#allocation4], 0 }
   0x2   :  { %15 = vsyncpa [#allocation4 + $0x1], 0 }
   0x3   :  { %16 = vsyncpa [#allocation9], 0 }
   0x4   :  { %17 = vsyncpa [#allocation5], 0 }
   0x5   :  { %19 = vsyncpa [#allocation5 + $0x1], 0 }
   0x6   :  { %20 = vsyncpa [#allocation13], 0  ;;  %s1275_s21 = smov 0   ;;  %s1277_s22 = smov 0  }
   0x7   :  { %s1279_s23 = smov 0   ;;  %s1281_s24 = smov 0  }
   0x8 LB: > { %s212_s27 = sshll.u32 %s1485_s3, 4  ;;  %s1299_s28 = sadd.s32 4294967295, %s1229_s24   ;;  %s1229_s24 = sphi %s1281_s24, %s1503_s24   ;;  %s1225_s23 = sphi %s1279_s23, %s1502_s23   ;;  %s1221_s22 = sphi %s1277_s22, %s1501_s22   ;;  %s1217_s21 = sphi %s1275_s21, %s1500_s21   ;;  %s213_s27 = int_to_ptr.hbm [resolvable:$true] %s212_s27 }
   0x9   : > { %p817_p0 = scmp.ge.s32.totalorder %s1229_s24, 1  ;;  %p68_p1 = scmp.eq.s32.totalorder %s1299_s28, 0 }
   0xa   : > { %p188_p2 = scmp.lt.s32.totalorder %s1229_s24, 9  ;;  %s1231_s30 = smov [#allocation8]  }
   0xb   : > { %s214_s7 = sshll.u32 %s1231_s30, 4  ;;  %s200_s10 = sshll.u32 %s1482_s0, 4  ;;  %s215_s7 = int_to_ptr.vmem [resolvable:$true] %s214_s7  ;;  %s201_s10 = int_to_ptr.vmem [resolvable:$true] %s200_s10 }
   0xc   : > { %p1305_p4 = pnand %p817_p0, %p188_p2  ;;  %s226_s14 = sshll.u32 %s1486_s4, 4  ;;  %s227_s14 = int_to_ptr.hbm [resolvable:$true] %s226_s14 }
   0xd   : > { %s1232_s15 = smov 192   ;;  %s1233_s16 = smov 12  }
   0xe   : > { %p935_p5 = pneg %p1305_p4  ;;  %s1234_s17 = smov [#allocation3]  }
   0xf   : > { %s1235_s18 = smov [#allocation10]   ;;  %s1236_s20 = smov 384  }
  0x10   : > { %p1316_p6 = pnand %p935_p5, %p68_p1  ;;  %s228_s19 = sshll.u32 %s1235_s18, 4  ;;  %s229_s19 = int_to_ptr.vmem [resolvable:$true] %s228_s19 }
  0x11   : > { %s1237_s25 = smov 24   ;;  %s816_s26 = sadd.s32 4294967294, %s1229_s24  }
  0x12   : > { %941 = dma.hbm_to_vmem [thread:$0]  (!%p1316_p6), %s213_s27, 2688, %s215_s7, [#allocation9], %s1232_s15, %s1232_s15, %s1233_s16  }
  0x13   : > { %938 = dma.vmem_to_smem (!%p1316_p6), %s201_s10, 128, %s1234_s17, [#allocation6]  }
  0x14   : > { %944 = dma.hbm_to_vmem [thread:$0]  (!%p1316_p6), %s227_s14, 1920, %s229_s19, [#allocation9], %s1236_s20, %s1236_s20, %s1237_s25  }
  0x15   : > { %s1331_s27 = sadd.s32 1, %s1229_s24   ;;  %s54_s30 = sadd.s32 1, %s1225_s23 }
  0x16   : > { %s51_s7 = ssub.s32 %s1229_s24, %s1331_s27  ;;  %p61_p7 = scmp.ne.s32.totalorder %s1225_s23, %s1221_s22 }
  0x17   : > { %p52_p8 = scmp.eq.s32.totalorder %s51_s7, 0  ;;  %p62_p9 = scmp.eq.s32.totalorder %s1229_s24, 0 }
  0x18   : > { %p67_p10 = scmp.ne.s32.totalorder %s1221_s22, %s1217_s21  ;;  %p1489_p11 = scmp.eq.s32.totalorder %s1299_s28, 7 }
  0x19   : > { %s1343_s8 = scalar_select %p52_p8, %s1225_s23, %s54_s30  }
  0x1a   : > { %p1347_p12 = por %p68_p1, %p67_p10  ;;  %p1353_p13 = por %p1489_p11, %p61_p7 }
  0x1b   : > { %p160_p0 = scmp.eq.s32.totalorder %s816_s26, 7  ;;  %p63_p2 = por %p62_p9, %p61_p7 }
  0x1c   : > { %s242_s11 = sand.u32 1, %s1225_s23   ;;  %p956_p6 = scmp.lt.s32.totalorder %s1229_s24, 8 }
  0x1d   : > { %p1358_p5 = por %p160_p0, %p67_p10  ;;  %s822_s13 = sshll.u32 %s242_s11, 3 }
  0x1e   : > { %s823_s14 = sshll.u32 %s1229_s24, 3  ;;  %s246_s19 = scalar_lea.vmem [#allocation7], %s822_s13 }
  0x1f   : > { %s250_s17 = scalar_lea.hbm %s1483_s1, %s823_s14  ;;  %s254_s20 = sshll.u32 %s246_s19, 4  ;;  %s255_s20 = int_to_ptr.vmem [resolvable:$true] %s254_s20 }
  0x20   : > { %s252_s18 = sshll.u32 %s250_s17, 4  ;;  %p1367_p8 = pnand %p956_p6, %p63_p2  ;;  %s253_s18 = int_to_ptr.hbm [resolvable:$true] %s252_s18 }
  0x21   : > { %s243_s26 = scalar_lea.sflag [#allocation4], %s242_s11  ;;  %s1093_s30 = sshra.s32 %s253_s18, 4  ;;  %s1094_s30 = int_to_ptr.hbm [resolvable:$true] %s1093_s30 }
  0x22   : > { %s1095_s7 = scalar_lea.hbm %s1094_s30, 8  ;;  %p1097_p9 = pneg %p1367_p8 }
  0x23   : > { %p1096_p7 = scmp.ne.s32.totalorder %s1094_s30, %s1095_s7  ;;  %s1100_s13 = scalar_lea.hbm %s1483_s1, 64 }
  0x24   : > { %p1101_p2 = scmp.lt.s32.totalorder %s1094_s30, %s1483_s1  ;;  %p1102_p6 = scmp.lt.s32.totalorder %s1100_s13, %s1095_s7 }
  0x25   : > { %p1098_p10 = pnand %p1097_p9, %p1096_p7 }
  0x26   : > { %p1103_p11 = por %p1102_p6, %p1101_p2 }
  0x27   : > { %p1099_p0 = pneg %p1098_p10 }
  0x29   : > { %p1104_p3 = pnand %p1103_p11, %p1099_p0 }
  0x2b   : > { %1107 = shalt.err (!%p1104_p3)
}
  0x2c   : > { %948 = dma.hbm_to_vmem [thread:$0]  (!%p1367_p8), %s253_s18, 128, %s255_s20, %s243_s26  }
  0x2d   : > { %263 = sbr.rel (%p1305_p4) target bundleno = 803 (0x323), region = 40 }
  0x32   : > { %1196 = dma.done.wait (%p68_p1), [#allocation6], 128  }
  0x33   : > { %1198 = vsyncadd (%p68_p1), [#allocation6], 4294967168  ;;  %s1388_s11 = sand.u32 1, %s1221_s22  }
  0x34   : > { %s826_s19 = sshll.u32 %s1388_s11, 3  ;;  %s271_s30 = scalar_lea.sflag [#allocation4], %s1388_s11 }
  0x35   : > { %s1392_s7 = scalar_lea.vmem [#allocation7], %s826_s19 }
  0x36   : > { %1200 = dma.done.wait (%p1347_p12), %s271_s30, 128  }
  0x37   : > { %1202 = vsyncadd (%p1347_p12), %s271_s30, 4294967168 }
  0x38   : > { %1204 = dma.done.wait (%p68_p1), [#allocation9], 4608  }
  0x39   : > { %1206 = vsyncadd (%p68_p1), [#allocation9], 4294962688 }
  0x3a   : > { %290 = sfence }
  0x3b   : > { %s1402_s29 = scalar_lea.vmem [#allocation11], %s826_s19  ;;  %p1496_p3 = scmp.ne.s32.totalorder %s1299_s28, 0 }
  0x3d   : > { %319 = sbr.rel (%p1496_p3) target bundleno = 68 (0x44), region = 60 }
  0x42   : > { %v320_v0 = vld [vmem:[%s1484_s2] sm:$0xff]  ;;  %vm321_vm0 = vcmask 261120  }
  0x43   : > { %322 = vst.msk [vmem:[#allocation2] sm:$0xff] %vm321_vm0, %v320_v0 }
  0x44 PF: > { %v328_v1 = vld [vmem:[#allocation10 + $0x60] sm:$0xff]  ;;  %v327_v2 = vld [vmem:[#allocation10 + $0x48] sm:$0xff]  ;;  %v909_v4 = vld [vmem:[#allocation8 + $0x38] sm:$0xf0]  ;;  %vm334_vm1 = vcmask 261120   ;;  %vm360_vm2 = vcmask 130048  }
  0x45   : > { %v848_v3 = vld [vmem:[#allocation8 + $0x30] sm:$0xf]  ;;  %350 = vmatpush.msra.mxu0 %v328_v1  ;;  %v326_v5 = vld [vmem:[#allocation10 + $0x30] sm:$0xff]  ;;  %v908_v6 = vld [vmem:[#allocation8 + $0x34] sm:$0xf]  ;;  %s832_s9 = sshll.u32 %s1299_s28, 7 }
  0x46   : > { %v849_v7 = vor.u32 %v909_v4, %v848_v3  ;;  %v850_v8 = vld [vmem:[#allocation8 + $0x3c] sm:$0xf0]  ;;  %v836_v10 = vld [vmem:[#allocation8 + $0x18] sm:$0xf]  ;;  %v906_v12 = vld [vmem:[#allocation8 + $0x20] sm:$0xf0] }
  0x47   : > { %v325_v9 = vld [vmem:[#allocation10 + $0x18] sm:$0xff]  ;;  %351 = vmatpush.msra.mxu0 %v327_v2  ;;  %v853_v11 = vor.u32 %v908_v6, %v850_v8  ;;  %v905_v14 = vld [vmem:[#allocation8 + $0x1c] sm:$0xf]  ;;  %v837_v15 = vor.u32 %v906_v12, %v836_v10  ;;  %v838_v16 = vld [vmem:[#allocation8 + $0x24] sm:$0xf0]  ;;  %s375_s25 = sld [smem:[#allocation3 + %s832_s9]] }
  0x48   : > { %435 = vmatpush.bf16.msra.mxu1 %v849_v7  ;;  %v902_v17 = vld [vmem:[#allocation8 + $0x4] sm:$0xf]  ;;  %v865_v18 = vld [vmem:[#allocation8 + $0xc] sm:$0xf0]  ;;  %v841_v19 = vor.u32 %v905_v14, %v838_v16  ;;  %v863_v21 = vld [vmem:[#allocation8] sm:$0xf] }
  0x49   : > { %352 = vmatpush.msra.mxu0 %v326_v5  ;;  %448 = vmatpush.bf16.msra.mxu2 %v853_v11  ;;  %v868_v20 = vor.u32 %v902_v17, %v865_v18  ;;  %v903_v22 = vld [vmem:[#allocation8 + $0x8] sm:$0xf0]  ;;  %v323_v25 = vld [vmem:[%s1392_s7] sm:$0xff]  ;;  %v910_v28 = vld [vmem:[#allocation8 + $0x40] sm:$0xf0]  ;;  %vm659_vm12 = vcmask 64512  }
  0x4a   : > { %v1409_v13 = vld [vmem:[#allocation2] sm:$0xff]  ;;  %v864_v23 = vor.u32 %v903_v22, %v863_v21  ;;  %v380_v26 = vpack.c.bf16 %v323_v25, %v323_v25  ;;  %v856_v27 = vld [vmem:[#allocation8 + $0x38] sm:$0xf]  ;;  %v844_v30 = vld [vmem:[#allocation8 + $0x20] sm:$0xf]  ;;  %s1239_s26 = smov [#allocation12]  }
  0x4b   : > { %353 = vmatpush.msra.mxu0 %v325_v9  ;;  %v385_v24 = vpack.c.bf16 %v1409_v13, %v1409_v13  ;;  %v857_v29 = vor.u32 %v910_v28, %v856_v27  ;;  %v907_v31 = vld [vmem:[#allocation8 + $0x28] sm:$0xf0]  ;;  %v330_v34 = vld [vmem:[#allocation10 + $0x2] ss:$8 sm:$0x7]  ;;  %s700_s14 = sshll.u32 %s1239_s26, 4  ;;  %s701_s14 = int_to_ptr.vmem [resolvable:$true] %s700_s14 }
  0x4c   : > { %436 = vmatpush.bf16.msra.mxu1 %v837_v15  ;;  %831 = vmatmul.msk.f32.vlgmr.msra.gmra.mxu0 %vm334_vm1, %v1409_v13  ;;  %v845_v32 = vor.u32 %v907_v31, %v844_v30  ;;  %v871_v35 = vld [vmem:[#allocation8 + $0x8] sm:$0xf]  ;;  %v904_v36 = vld [vmem:[#allocation8 + $0x10] sm:$0xf0]  ;;  %v332_v39 = vperm.slane %v330_v34, 0  ;;  %s702_s16 = sshll.u32 %s1488_s6, 4  ;;  %s703_s16 = int_to_ptr.hbm [resolvable:$true] %s702_s16 }
  0x4d   : > { %449 = vmatpush.bf16.msra.mxu2 %v841_v19  ;;  %494 = vmatpush.bf16.msrb.mxu0 %v864_v23  ;;  %v872_v38 = vor.u32 %v904_v36, %v871_v35  ;;  %v884_v45 = vld [vmem:[#allocation8 + $0x60] sm:$0xf]  ;;  %v912_v46 = vld [vmem:[#allocation8 + $0x68] sm:$0xf0]  ;;  %v880_v47 = vld [vmem:[#allocation8 + $0x48] sm:$0xf] }
  0x4e   : > { %461 = vmatpush.bf16.msra.mxu3 %v857_v29  ;;  %v885_v49 = vor.u32 %v912_v46, %v884_v45  ;;  %v911_v50 = vld [vmem:[#allocation8 + $0x50] sm:$0xf0]  ;;  %v1423_v55 = vld [vmem:[#allocation10] ss:$8 sm:$0x7]  ;;  %p1497_p1 = scmp.eq.s32.totalorder %s1299_s28, 7 }
  0x4f   : > { %858 = vmatmul.msk.bf16.vlgmr.msra.gmra.mxu1 %vm334_vm1, %v385_v24  ;;  %v881_v52 = vor.u32 %v911_v50, %v880_v47  ;;  %v529_v57 = vperm.slane %v1423_v55, 1  ;;  %v528_v15 = vperm.slane %v1423_v55, 0  ;;  %v893_v28 = vld [vmem:[#allocation8 + $0x90] sm:$0xf]  ;;  %v914_v29 = vld [vmem:[#allocation8 + $0x98] sm:$0xf0] }
  0x50   : > { %507 = vmatpush.bf16.msrb.mxu1 %v868_v20  ;;  %859 = vmatmul.msk.bf16.vlgmr.msra.gmra.mxu2 %vm334_vm1, %v385_v24  ;;  %v894_v31 = vor.u32 %v914_v29, %v893_v28  ;;  %v913_v34 = vld [vmem:[#allocation8 + $0x80] sm:$0xf0]  ;;  %s897_s17 = sshll.u32 %s1299_s28, 3  ;;  %s688_s18 = sshll.u32 %s1402_s29, 4  ;;  %s689_s18 = int_to_ptr.vmem [resolvable:$true] %s688_s18 }
  0x51   : > { %520 = vmatpush.bf16.msrb.mxu2 %v872_v38  ;;  %s686_s7 = scalar_lea.hbm %s1487_s5, %s897_s17  ;;  %s676_s9 = scalar_lea.sflag [#allocation5], %s1388_s11 }
  0x52   : > { %462 = vmatpush.bf16.msra.mxu3 %v845_v32  ;;  %652 = vmatpush.bf16.msra.mxu0 %v894_v31  ;;  %s690_s20 = sshll.u32 %s686_s7, 4  ;;  %s1171_s13 = scalar_lea.hbm %s1487_s5, 64  ;;  %s691_s20 = int_to_ptr.hbm [resolvable:$true] %s690_s20 }
  0x54   : > { %873 = vmatmul.msk.bf16.vlgmr.msrb.gmra.mxu0 %vm360_vm2, %v380_v26 }
  0x55   : > { %860 = vmatmul.msk.bf16.vlgmr.msra.gmra.mxu3 %vm334_vm1, %v385_v24 }
  0x56   : > { %602 = vmatpush.bf16.msrb.mxu3 %v885_v49 }
  0x5a   : > { %603 = vmatpush.bf16.msrb.mxu3 %v881_v52 }
  0x5f   : > { %874 = vmatmul.msk.bf16.vlgmr.msrb.gmra.mxu1 %vm360_vm2, %v380_v26 }
  0x60   : > { %875 = vmatmul.msk.bf16.vlgmr.msrb.gmra.mxu2 %vm360_vm2, %v380_v26 }
  0xc9   : > { %v355_v33 = vpop.f32.mrf.mxu0 }
  0xca   : > { %v356_v40 = vadd.f32 %v355_v33, %v332_v39  ;;  %v889_v33 = vld [vmem:[#allocation8 + $0x78] sm:$0xf] }
  0xcb   : > { %v890_v36 = vor.u32 %v913_v34, %v889_v33 }
  0xcc   : > { %v438_v37 = vpop.f32.mrf.mxu1  ;;  %v358_v48 = vsub.f32 %v356_v40, %v323_v25 }
  0xcd   : > { %653 = vmatpush.bf16.msra.mxu0 %v890_v36 }
  0xce   : > { %v359_v51 = vand.u32 2147483647, %v358_v48 }
  0xd0   : > { %v361_v53 = vsel %vm360_vm2, %v359_v51, 0.0  ;;  %v376_v51 = vstv %s375_s25  ;;  %s1165_s25 = sshra.s32 %s691_s20, 4  ;;  %s1166_s25 = int_to_ptr.hbm [resolvable:$true] %s1165_s25 }
  0xd1   : > { %v496_v41 = vpop.f32.mrf.mxu0  ;;  %362 = vadd.xlane.f32.xlu0 %v361_v53  ;;  %s1167_s26 = scalar_lea.hbm %s1166_s25, 8  ;;  %p1172_p8 = scmp.lt.s32.totalorder %s1166_s25, %s1487_s5 }
  0xd2   : > { %v497_v42 = vadd.f32 %v496_v41, %v438_v37  ;;  %p1168_p4 = scmp.ne.s32.totalorder %s1166_s25, %s1167_s26  ;;  %p1173_p7 = scmp.lt.s32.totalorder %s1171_s13, %s1167_s26 }
  0xd3   : > { %v451_v43 = vpop.f32.mrf.mxu2 }
  0xd4   : > { %v440_v44 = vpop.f32.mrf.mxu1  ;;  %v534_v18 = vadd.f32 %v528_v15, %v497_v42  ;;  %p1169_p11 = pnand %p1168_p4, %p1353_p13  ;;  %p1174_p9 = por %p1173_p7, %p1172_p8 }
  0xd6   : > { %v876_v19 = vmul.f32 -1.442695, %v534_v18  ;;  %p1170_p12 = pneg %p1169_p11 }
  0xd8   : > { %v464_v14 = vpop.f32.mrf.mxu3  ;;  %p1175_p10 = pnand %p1174_p9, %p1170_p12 }
  0xd9   : > { %v498_v54 = vpop.f32.mrf.mxu0 }
  0xdb   : > { %v453_v56 = vpop.f32.mrf.mxu2 }
  0xdc   : > { %v509_v58 = vpop.f32.mrf.mxu1 }
  0xdd   : > { %v510_v59 = vadd.f32 %v509_v58, %v451_v43  ;;  %v530_v43 = vperm.slane %v1423_v55, 2 }
  0xdf   : > { %v535_v60 = vadd.f32 %v529_v57, %v510_v59  ;;  %v1238_v57 = vmov 0.0  }
  0xe0   : > { %v466_v16 = vpop.f32.mrf.mxu3 }
  0xe1   : > { %v877_v61 = vmul.f32 -1.442695, %v535_v60 }
  0xe3   : > { %1004 = vpow2.f32 %v877_v61  ;;  %v522_v17 = vpop.f32.mrf.mxu2 }
  0xe4   : > { %v511_v62 = vpop.f32.mrf.mxu1  ;;  %v523_v42 = vadd.f32 %v522_v17, %v464_v14 }
  0xe6   : > { %v536_v46 = vadd.f32 %v530_v43, %v523_v42 }
  0xe9   : > { %v1005_v63 = vpop.eup %1004 }
  0xea   : > { %v559_v0 = vadd.f32 1.0, %v1005_v63 }
  0xeb   : > { %v524_v20 = vpop.f32.mrf.mxu2 }
  0xec   : > { %1006 = vrcp.f32 %v559_v0  ;;  %v571_v4 = vand.u32 2147483648, %v559_v0  ;;  %v569_v6 = vand.u32 2147483647, %v559_v0  ;;  %vm565_vm4 = vweird.f32 %v559_v0 }
  0xed   : > { %1008 = vpow2.f32 %v876_v19 }
  0xee   : > { %v572_v8 = vor.u32 1.1754944e-38, %v571_v4  ;;  %vm570_vm6 = vcmp.eq.f32.partialorder %v569_v6, 8.507059e+37 }
  0xf2   : > { %v1007_v1 = vpop.eup %1006 }
  0xf3   : > { %v561_v2 = vmul.f32 %v1007_v1, %v559_v0  ;;  %vm566_vm3 = vweird.f32 %v1007_v1  ;;  %v1009_v24 = vpop.eup %1008 }
  0xf4   : > { %vm567_vm5 = vmor %vm565_vm4, %vm566_vm3  ;;  %v540_v26 = vadd.f32 1.0, %v1009_v24 }
  0xf5   : > { %v562_v3 = vsub.f32 1.0, %v561_v2 }
  0xf6   : > { %1010 = vrcp.f32 %v540_v26  ;;  %v552_v47 = vand.u32 2147483648, %v540_v26  ;;  %vm546_vm8 = vweird.f32 %v540_v26  ;;  %v550_v49 = vand.u32 2147483647, %v540_v26 }
  0xf7   : > { %v563_v5 = vmul.f32 %v1007_v1, %v562_v3 }
  0xf8   : > { %v553_v54 = vor.u32 1.1754944e-38, %v552_v47  ;;  %vm551_vm11 = vcmp.eq.f32.partialorder %v550_v49, 8.507059e+37 }
  0xf9   : > { %v564_v7 = vadd.f32 %v1007_v1, %v563_v5  ;;  %v627_v5 = vld [vmem:[#allocation10 + $0x1] ss:$8 sm:$0x7] }
  0xfa   : > { %v629_v6 = vperm.slane %v627_v5, 0 }
  0xfb   : > { %v568_v9 = vsel %vm567_vm5, %v1007_v1, %v564_v7 }
  0xfc   : > { %v573_v10 = vsel %vm570_vm6, %v572_v8, %v568_v9  ;;  %v1011_v32 = vpop.eup %1010 }
  0xfd   : > { %v575_v11 = vmul.f32 %v573_v10, %v1409_v13  ;;  %v542_v37 = vmul.f32 %v1011_v32, %v540_v26  ;;  %vm547_vm7 = vweird.f32 %v1011_v32 }
  0xfe   : > { %vm548_vm9 = vmor %vm546_vm8, %vm547_vm7 }
  0xff   : > { %v576_v12 = vpack.c.bf16 %v575_v11, %v575_v11  ;;  %v543_v39 = vsub.f32 1.0, %v542_v37 }
 0x101   : > { %886 = vmatmul.msk.bf16.vlgmr.msrb.gmra.mxu3 %vm334_vm1, %v576_v12  ;;  %v544_v41 = vmul.f32 %v1011_v32, %v543_v39 }
 0x103   : > { %v545_v45 = vadd.f32 %v1011_v32, %v544_v41 }
 0x105   : > { %v549_v53 = vsel %vm548_vm9, %v1011_v32, %v545_v45 }
 0x106   : > { %v554_v56 = vsel %vm551_vm11, %v553_v54, %v549_v53 }
 0x107   : > { %v612_v58 = vsub.f32 1.0, %v554_v56  ;;  %v611_v62 = vmul.f32 %v554_v56, %v1409_v13 }
 0x144   : > { %v363_v21 = vpop.xlane.xlu0 %362 }
 0x145   : > { %v364_v22 = vrot.slane %v363_v21, 4 }
 0x147   : > { %v365_v23 = vadd.f32 %v364_v22, %v363_v21 }
 0x149   : > { %v366_v25 = vrot.slane %v365_v23, 2 }
 0x14b   : > { %v367_v27 = vadd.f32 %v366_v25, %v365_v23 }
 0x14d   : > { %v368_v30 = vrot.slane %v367_v27, 1 }
 0x14f   : > { %v369_v35 = vadd.f32 %v368_v30, %v367_v27 }
 0x151   : > { %v370_v38 = vmul.f32 0.0078125, %v369_v35 }
 0x153   : > { %v371_v40 = vsub.f32 1.0, %v370_v38 }
 0x155   : > { %v372_v44 = vmax.f32 %v371_v40, 0.0 }
 0x157   : > { %v373_v48 = vmin.f32 %v372_v44, 1.0 }
 0x159   : > { %vm377_vm10 = vcmp.lt.f32.partialorder %v376_v51, %v373_v48 }
 0x15a   : > { %v833_v55 = vsel %vm377_vm10, 1.0, %v1238_v57 }
 0x15b   : > { %v616_v61 = vsub.f32 1.0, %v833_v55 }
 0x15d   : > { %v617_v1 = vmul.f32 %v616_v61, %v1409_v13 }
 0x184   : > { %v605_v50 = vpop.f32.mrf.mxu3 }
 0x185   : > { %v609_v52 = vadd.f32 %v605_v50, %v536_v46 }
 0x187   : > { %1012 = vtanh.f32 %v609_v52 }
 0x18c   : > { %v607_v59 = vpop.f32.mrf.mxu3 }
 0x18d   : > { %v1013_v60 = vpop.eup %1012 }
 0x18e   : > { %v613_v63 = vmul.f32 %v1013_v60, %v612_v58 }
 0x190   : > { %v614_v0 = vadd.f32 %v613_v63, %v611_v62 }
 0x192   : > { %v615_v2 = vmul.f32 %v833_v55, %v614_v0 }
 0x194   : > { %v618_v3 = vadd.f32 %v617_v1, %v615_v2 }
 0x196   : > { %619 = vst.msk [vmem:[#allocation2] sm:$0xff] %vm334_vm1, %v618_v3  ;;  %v621_v4 = vpack.c.bf16 %v618_v3, %v618_v3 }
 0x197   : > { %620 = vst.msk [vmem:[#allocation12] sm:$0xff] %vm334_vm1, %v618_v3 }
 0x198   : > { %895 = vmatmul.msk.bf16.vlgmr.msra.gmra.mxu0 %vm334_vm1, %v621_v4  ;;  %931 = dma.vmem_to_hbm [thread:$0]  (%p1497_p1), %s701_s14, 128, %s703_s16, [#allocation13]  }
 0x215   : > { %v655_v7 = vpop.f32.mrf.mxu0 }
 0x216   : > { %v656_v8 = vadd.f32 %v655_v7, %v629_v6 }
 0x218   : > { %v660_v9 = vsel %vm659_vm12, %v656_v8, -inf }
 0x219   : > { %661 = vmax.xlane.f32.xlu0 %v660_v9 }
 0x21d   : > { %v657_v10 = vpop.f32.mrf.mxu0 }
 0x28c   : > { %v662_v13 = vpop.xlane.xlu0 %661 }
 0x28d   : > { %v663_v11 = vsub.f32 %v656_v8, %v662_v13 }
 0x28f   : > { %v664_v12 = vmul.f32 1.442695, %v663_v11 }
 0x291   : > { %1014 = vpow2.f32 %v664_v12 }
 0x297   : > { %v1015_v14 = vpop.eup %1014 }
 0x298   : > { %v666_v15 = vsel %vm659_vm12, %v1015_v14, 0.0 }
 0x299   : > { %667 = vadd.xlane.f32.xlu1 %v666_v15 }
 0x30c   : > { %v668_v16 = vpop.xlane.xlu1 %667 }
 0x30d   : > { %1016 = vlog2.f32 %v668_v16 }
 0x313   : > { %v1017_v17 = vpop.eup %1016 }
 0x314   : > { %v670_v18 = vmul.f32 0.6931472, %v1017_v17 }
 0x316   : > { %v671_v19 = vadd.f32 %v670_v18, %v662_v13 }
 0x318   : > { %v672_v20 = vsub.f32 %v656_v8, %v671_v19 }
 0x31a   : > { %v673_v21 = vsel %vm659_vm12, %v672_v20, 0.0 }
 0x31b   : > { %674 = vst [vmem:[%s1402_s29] sm:$0xff] %v673_v21 }
 0x31c   : > { %1178 = shalt.err (!%p1175_p10)
}
 0x31d   : > { %929 = dma.vmem_to_hbm [thread:$0]  (%p1353_p13), %s689_s18, 128, %s691_s20, %s676_s9  }
 0x31e   : > { %p1498_p0 = pmov %p1497_p1 }
 0x320   : > { %1208 = dma.done.wait (%p1498_p0), [#allocation13], 128   ;;  %p1499_p2 = pmov %p1498_p0 }
 0x322   : > { %1210 = vsyncadd (%p1499_p2), [#allocation13], 4294967168 }
 0x323 PF: > { %p962_p6 = scmp.ge.s32.totalorder %s1229_s24, 2  ;;  %s719_s11 = sand.u32 1, %s1217_s21  }
 0x324   : > { %s720_s29 = scalar_lea.sflag [#allocation5], %s719_s11 }
 0x325   : > { %p950_p3 = pnand %p962_p6, %p1358_p5 }
 0x327   : > { %p951_p1 = pneg %p950_p3 }
 0x329   : > { %1212 = dma.done.wait (%p951_p1), %s720_s29, 128  }
 0x32a   : > { %1214 = vsyncadd (%p951_p1), %s720_s29, 4294967168  ;;  %p23_p13 = scmp.ge.s32.totalorder %s1331_s27, 10   ;;  %s1500_s21 = smov %s1221_s22 }
 0x32b   : > { %s1501_s22 = smov %s1225_s23  ;;  %s1502_s23 = smov %s1343_s8 }
 0x32c   : > { %s1503_s24 = smov %s1331_s27  ;;  %25 = sbr.rel (!%p23_p13) target bundleno = 8 (0x8), region = 112 }
 0x331   :  { %726 = vsyncpa [#allocation4], 1 }
 0x332   :  { %728 = vsyncpa [#allocation4 + $0x1], 1 }
 0x333   :  { %729 = vsyncpa [#allocation9], 1 }
 0x334   :  { %730 = vsyncpa [#allocation5], 1 }
 0x335   :  { %732 = vsyncpa [#allocation5 + $0x1], 1 }
 0x336   :  { %733 = vsyncpa [#allocation13], 1 }
 0x337   :  { %734 = vsyncpa [#allocation6], 1 }
 0x338   :  { %736 = vsyncpa [#allocation6 + $0x1], 1 }

</bundles_post_ra>
